<compile_context>
chip_gen: v6e
topology: v6e:2x2x1
jax: 0.10.0
libtpu: 0.0.40
codegen_flags: <defaults>
</compile_context>

<pallas_src>
import functools

import jax
import jax.numpy as jnp
from jax.experimental import pallas as pl
from jax.experimental.pallas import tpu as pltpu


# ---------------------------------------------------------------------------
# Kernels
# ---------------------------------------------------------------------------

def _resident_kernel(x_ref, w_ref, shift_ref, o_ref):
    """Path A: grid=(grid_m,).  Weight/shift resident in VMEM, rows stream."""
    # Cast the streamed x tile to the matmul dtype inside VMEM: HBM still reads
    # the caller's dtype, MXU runs the fast bf16 path, accumulation stays f32.
    x = x_ref[...].astype(w_ref.dtype)
    y = jnp.dot(x, w_ref[...], preferred_element_type=jnp.float32)
    y = y + shift_ref[...]              # Linear bias + BatchNorm1d(eval); scale pre-folded into w
    y = jnp.maximum(y, 0.01 * y)        # LeakyReLU(negative_slope=0.01)
    o_ref[...] = y.astype(o_ref.dtype)  # Dropout: identity at inference


def _tiled_kernel(x_ref, w_ref, shift_ref, o_ref, acc_ref):
    """Path B: grid=(grid_m, grid_n, grid_k).  Large weights tiled over N and K."""
    @pl.when(pl.program_id(2) == 0)
    def _():
        acc_ref[...] = jnp.zeros_like(acc_ref)

    x = x_ref[...].astype(w_ref.dtype)
    acc_ref[...] += jnp.dot(x, w_ref[...], preferred_element_type=jnp.float32)

    @pl.when(pl.program_id(2) == pl.num_programs(2) - 1)
    def _():
        y = acc_ref[...] + shift_ref[...]
        y = jnp.maximum(y, 0.01 * y)
        o_ref[...] = y.astype(o_ref.dtype)


# ---------------------------------------------------------------------------
# Helpers
# ---------------------------------------------------------------------------

def _round_up(x, m):
    return ((x + m - 1) // m) * m


def _sublane_multiple(*dtypes):
    """Sublane packing multiple for the given dtypes (f32->8, bf16->16, i8->32)."""
    m = 8
    for dt in dtypes:
        m = max(m, 32 // jnp.dtype(dt).itemsize)
    return m


def _spec(shape, index_map, buffers=None):
    """BlockSpec, optionally requesting an explicit pipeline buffer count."""
    if buffers is not None and hasattr(pl, "Buffered"):
        try:
            return pl.BlockSpec(shape, index_map, pipeline_mode=pl.Buffered(buffers))
        except TypeError:
            pass  # older API without pipeline_mode: fall back to default buffering
    return pl.BlockSpec(shape, index_map)


def _pick_tile(dim, candidates):
    """Largest candidate that divides dim, else the full dim (single tile)."""
    for c in candidates:
        if dim % c == 0:
            return c
    return dim


# ---------------------------------------------------------------------------
# Fused forward
# ---------------------------------------------------------------------------

def single_linear_forward(x, weight, bias, gamma, beta, running_mean, running_var,
                          *, eps=1e-5, use_bf16_matmul=True,
                          resident_weight_limit_bytes=16 * 1024 * 1024):
    """Fused inference-mode forward of SingleLinear.

    x:      (M, C_in)
    weight: (C_out, C_in)  -- PyTorch nn.Linear layout
    bias, gamma, beta, running_mean, running_var: (C_out,)
    returns (M, C_out) in x.dtype
    """
    M, C_in = x.shape
    C_out = weight.shape[0]
    out_dtype = x.dtype

    # --- Fold Linear bias + eval-mode BatchNorm1d (in f32, before any cast) ---
    scale = (gamma / jnp.sqrt(running_var + eps)).astype(jnp.float32)   # (C_out,)
    shift = ((bias - running_mean) * scale + beta).astype(jnp.float32)  # (C_out,)
    mat_dtype = jnp.bfloat16 if use_bf16_matmul else x.dtype
    # Fold the BN scale into the weight columns so the kernel epilogue is a
    # single add + LeakyReLU (scale applied once at trace time, in f32).
    w_fold = (weight.astype(jnp.float32).T * scale[None, :]).astype(mat_dtype)  # (C_in, C_out)
    shift2d = shift.reshape(1, C_out)

    x_bytes = jnp.dtype(x.dtype).itemsize
    out_bytes = jnp.dtype(out_dtype).itemsize
    w_item = jnp.dtype(mat_dtype).itemsize
    sub = _sublane_multiple(x.dtype, out_dtype)

    # --- Adaptive row tile ----------------------------------------------------
    # Big enough to amortize the ~0.35us/step overhead, small enough that there
    # are >= ~8 pipelined steps (several per TensorCore on v7x) and that the
    # double-buffered x+out tiles stay within a modest slice of scoped VMEM.
    per_row_bytes = C_in * x_bytes + C_out * out_bytes
    vmem_rows = max(128, ((8 * 1024 * 1024) // (2 * per_row_bytes)) // 128 * 128)
    if M <= 256 and M <= vmem_rows:
        tm = _round_up(M, sub)                       # one/few blocks, dtype-aligned
    else:
        target = max(128, (M // 8) // 128 * 128)     # aim for >= ~8 grid steps
        tm = max(128, min(1024, target, vmem_rows))
    grid_m = pl.cdiv(M, tm)

    cost = pl.CostEstimate(
        flops=2 * M * C_in * C_out,
        transcendentals=0,
        bytes_accessed=(M * C_in * x_bytes + M * C_out * out_bytes
                        + C_in * C_out * w_item + C_out * 4),
    )

    weight_bytes = C_in * C_out * w_item
    if weight_bytes <= resident_weight_limit_bytes:
        # ------------------------------------------------------------------ #
        # Path A: weight fully resident in VMEM, rows stream through a 1-D grid.
        # Single-buffer the weight only when its double-buffered footprint
        # would actually matter (tiny weights keep the default pipelining).
        # ------------------------------------------------------------------ #
        w_buffers = 1 if weight_bytes > (4 * 1024 * 1024) else None
        grid = (grid_m,)
        in_specs = [
            pl.BlockSpec((tm, C_in), lambda i: (i, 0)),               # rows stream
            _spec((C_in, C_out), lambda i: (0, 0), buffers=w_buffers),  # weight resident
            pl.BlockSpec((1, C_out), lambda i: (0, 0)),               # shift resident
        ]
        out_specs = pl.BlockSpec((tm, C_out), lambda i: (i, 0))
        scratch_shapes = ()
        kernel = _resident_kernel
        dim_sems = ("parallel",)
        needed = (weight_bytes * (1 if w_buffers == 1 else 2) + 2 * C_out * 4
                  + 2 * tm * (C_in * x_bytes + C_out * out_bytes))
    else:
        # ------------------------------------------------------------------ #
        # Path B: weight too large to keep resident (e.g. wide layers on v7x's
        # 64 MiB VMEM): tile C_out (parallel) and C_in (reduction, innermost,
        # arbitrary) with an f32 accumulator and pl.when init/finalize.
        # ------------------------------------------------------------------ #
        tn = _pick_tile(C_out, (256, 128))
        tk = _pick_tile(C_in, (512, 256, 128))   # tk divides C_in: no OOB garbage
                                                 # can enter the K reduction
        grid_n = pl.cdiv(C_out, tn)
        grid_k = C_in // tk
        grid = (grid_m, grid_n, grid_k)
        in_specs = [
            pl.BlockSpec((tm, tk), lambda i, j, k: (i, k)),
            pl.BlockSpec((tk, tn), lambda i, j, k: (k, j)),
            pl.BlockSpec((1, tn), lambda i, j, k: (0, j)),
        ]
        out_specs = pl.BlockSpec((tm, tn), lambda i, j, k: (i, j))
        scratch_shapes = (pltpu.VMEM((tm, tn), jnp.float32),)
        kernel = _tiled_kernel
        dim_sems = ("parallel", "parallel", "arbitrary")
        needed = (2 * tm * tk * x_bytes + 2 * tk * tn * w_item
                  + 2 * tm * tn * out_bytes + tm * tn * 4 + 2 * tn * 4)

    # Explicit scoped-VMEM limit: v5e defaults to only 16 MiB, which would cap
    # larger tiles; keep it modest (<= 64 MiB so it is valid on v7x as well).
    vmem_limit = int(min(64 * 1024 * 1024, max(32 * 1024 * 1024, 2 * needed)))

    out = pl.pallas_call(
        kernel,
        out_shape=jax.ShapeDtypeStruct((M, C_out), out_dtype),  # no pad / slice:
        grid=grid,                                               # ragged last row
        in_specs=in_specs,                                       # block is write-masked
        out_specs=out_specs,
        scratch_shapes=scratch_shapes,
        compiler_params=pltpu.CompilerParams(
            dimension_semantics=dim_sems,
            vmem_limit_bytes=vmem_limit,
        ),
        cost_estimate=cost,
    )(x, w_fold, shift2d)
    return out


# ---------------------------------------------------------------------------
# Demo / self-check
# ---------------------------------------------------------------------------

if __name__ == "__main__":
    key = jax.random.PRNGKey(0)
    k_x, k_w, k_b, k_g, k_be, k_m, k_v = jax.random.split(key, 7)

    # Lane-dense 128-wide features; batch exercises multi-step pipelining and
    # the ragged (1000 % 128 != 0) last-row-block path with no host padding.
    B, C_in, C_out = 1000, 128, 128
    dropout_p = 0.1  # inference: Dropout is identity

    x = jax.random.normal(k_x, (B, C_in), dtype=jnp.float32)

    # nn.Linear default init
    bound = 1.0 / (C_in ** 0.5)
    weight = jax.random.uniform(k_w, (C_out, C_in),
                                minval=-bound, maxval=bound, dtype=jnp.float32)
    bias = jax.random.uniform(k_b, (C_out,),
                              minval=-bound, maxval=bound, dtype=jnp.float32)

    # Non-trivial BatchNorm1d parameters / running statistics
    gamma = 1.0 + 0.1 * jax.random.normal(k_g, (C_out,), dtype=jnp.float32)
    beta = 0.1 * jax.random.normal(k_be, (C_out,), dtype=jnp.float32)
    running_mean = 0.1 * jax.random.normal(k_m, (C_out,), dtype=jnp.float32)
    running_var = jax.random.uniform(k_v, (C_out,),
                                     minval=0.5, maxval=1.5, dtype=jnp.float32)

    # Plain-JAX f32 reference: Linear -> BatchNorm1d(eval) -> LeakyReLU -> Dropout(id)
    eps = 1e-5
    ref_scale = gamma / jnp.sqrt(running_var + eps)
    ref_shift = (bias - running_mean) * ref_scale + beta
    lin = jnp.dot(x, weight.T, preferred_element_type=jnp.float32)
    ref = lin * ref_scale[None, :] + ref_shift[None, :]
    ref = jnp.where(ref >= 0, ref, 0.01 * ref)

    # Path A: resident-weight kernel (the common case).
    fwd = jax.jit(single_linear_forward)
    out = fwd(x, weight, bias, gamma, beta, running_mean, running_var)
    jax.block_until_ready(out)
    assert out.shape == (B, C_out) and out.dtype == x.dtype
    err = float(jnp.max(jnp.abs(out - ref)))
    assert jnp.allclose(out, ref, atol=2e-2, rtol=2e-2), err  # bf16-matmul tolerance

    # Path B: force the N/K-tiled variant (used when the weight would not fit
    # resident in VMEM, e.g. wide layers on v7x) and check it matches too.
    fwd_tiled = jax.jit(functools.partial(single_linear_forward,
                                          resident_weight_limit_bytes=0))
    out_t = fwd_tiled(x, weight, bias, gamma, beta, running_mean, running_var)
    jax.block_until_ready(out_t)
    err_t = float(jnp.max(jnp.abs(out_t - ref)))
    assert out_t.shape == (B, C_out)
    assert jnp.allclose(out_t, ref, atol=2e-2, rtol=2e-2), err_t

    print("KERNEL_OK")
</pallas_src>

<mosaic_0001>
module attributes {stable_mosaic.version = 11 : i64} {
  func.func @_resident_kernel(%arg0: i32, %arg1: memref<128x128xf32, #tpu.memory_space<vmem>>, %arg2: memref<128x128xbf16, #tpu.memory_space<vmem>>, %arg3: memref<1x128xf32, #tpu.memory_space<vmem>>, %arg4: memref<128x128xf32, #tpu.memory_space<vmem>>) attributes {dimension_semantics = [#tpu.dimension_semantics<parallel>], iteration_bounds = array<i64: 8>, scalar_prefetch = 0 : i64, scratch_operands = 0 : i64, tpu.core_type = #tpu.core_type<tc>, window_params = [{transform_indices = @transform_0, window_bounds = array<i64: 128, 128>}, {pipeline_mode = #tpu.pipeline_mode<synchronous>, transform_indices = @transform_1, window_bounds = array<i64: 128, 128>}, {pipeline_mode = #tpu.pipeline_mode<synchronous>, transform_indices = @transform_2, window_bounds = array<i64: 1, 128>}, {transform_indices = @transform_3, window_bounds = array<i64: 128, 128>}]} {
    %c0 = arith.constant 0 : index
    %c0_0 = arith.constant 0 : index
    %0 = vector.load %arg1[%c0, %c0_0] : memref<128x128xf32, #tpu.memory_space<vmem>>, vector<128x128xf32>
    %1 = arith.truncf %0 : vector<128x128xf32> to vector<128x128xbf16>
    %c0_1 = arith.constant 0 : index
    %c0_2 = arith.constant 0 : index
    %2 = vector.load %arg2[%c0_1, %c0_2] : memref<128x128xbf16, #tpu.memory_space<vmem>>, vector<128x128xbf16>
    %cst = arith.constant dense<0.000000e+00> : vector<128x128xf32>
    %3 = tpu.matmul %1, %2, %cst {dimension_numbers = #tpu.dot_dimension_numbers<[1], [0], [0], [1], [0, 0, 1, 1], [], []>} : vector<128x128xbf16>, vector<128x128xbf16>, vector<128x128xf32> -> vector<128x128xf32>
    %c0_3 = arith.constant 0 : index
    %c0_4 = arith.constant 0 : index
    %4 = vector.load %arg3[%c0_3, %c0_4] : memref<1x128xf32, #tpu.memory_space<vmem>>, vector<1x128xf32>
    %5 = vector.broadcast %4 : vector<1x128xf32> to vector<128x128xf32>
    %6 = arith.addf %3, %5 : vector<128x128xf32>
    %cst_5 = arith.constant 0.00999999977 : f32
    %7 = vector.broadcast %cst_5 : f32 to vector<128x128xf32>
    %8 = arith.mulf %7, %6 : vector<128x128xf32>
    %9 = arith.maximumf %6, %8 : vector<128x128xf32>
    %c0_6 = arith.constant 0 : index
    %c0_7 = arith.constant 0 : index
    %10 = vector.load %arg4[%c0_6, %c0_7] : memref<128x128xf32, #tpu.memory_space<vmem>>, vector<128x128xf32>
    tpu.vector_store %arg4[%c0_6, %c0_7], %9 {strides = array<i32>} : memref<128x128xf32, #tpu.memory_space<vmem>>, vector<128x128xf32>,
    return
  }
  func.func @transform_0(%arg0: i32) -> (i32, i32) {
    %c0_i32 = arith.constant 0 : i32
    %c0_i32_0 = arith.constant 0 : i32
    return %arg0, %c0_i32 : i32, i32
  }
  func.func @transform_1(%arg0: i32) -> (i32, i32) {
    %c0_i32 = arith.constant 0 : i32
    %c0_i32_0 = arith.constant 0 : i32
    %c0_i32_1 = arith.constant 0 : i32
    return %c0_i32, %c0_i32_0 : i32, i32
  }
  func.func @transform_2(%arg0: i32) -> (i32, i32) {
    %c0_i32 = arith.constant 0 : i32
    %c0_i32_0 = arith.constant 0 : i32
    %c0_i32_1 = arith.constant 0 : i32
    return %c0_i32, %c0_i32_0 : i32, i32
  }
  func.func @transform_3(%arg0: i32) -> (i32, i32) {
    %c0_i32 = arith.constant 0 : i32
    %c0_i32_0 = arith.constant 0 : i32
    return %arg0, %c0_i32 : i32, i32
  }
}

</mosaic_0001>

<bundles_post_ra>
// kernel: single_linear_forward.1
= control target key start
LH: loop header
LB: loop body
LE: loop exit
PB: predicated region body
PF: predicated region fallthrough
CT: control target
= control target key end

     0   :  { %8 = vsyncpa [#allocation3], 0  ;;  %s1056_s0 = inlined_call_operand.hbm [shape: f32[1000,128], index: 0, kind: input, shape index: {}]   ;;  %s1057_s1 = inlined_call_operand.vmem [shape: bf16[128,128], index: 1, kind: input, shape index: {}]   ;;  %s1058_s2 = inlined_call_operand.vmem [shape: f32[1,128], index: 2, kind: input, shape index: {}]   ;;  %s1059_s3 = inlined_call_operand.hbm [shape: f32[1000,128], index: 3, kind: output, shape index: {}]  }
   0x1   :  { %10 = vsyncpa [#allocation3 + $0x1], 0 }
   0x2   :  { %11 = vsyncpa [#allocation4], 0 }
   0x3   :  { %13 = vsyncpa [#allocation4 + $0x1], 0  ;;  %s805_s12 = smov 0   ;;  %s807_s13 = smov 0  }
   0x4   :  { %s809_s14 = smov 0   ;;  %s811_s15 = smov 0  }
   0x5 LB: > { %s826_s16 = sadd.s32 4294967295, %s777_s15   ;;  %s539_s17 = sadd.s32 4294967294, %s777_s15   ;;  %s777_s15 = sphi %s811_s15, %s1067_s15   ;;  %s773_s14 = sphi %s809_s14, %s1066_s14   ;;  %s769_s13 = sphi %s807_s13, %s1065_s13   ;;  %s765_s12 = sphi %s805_s12, %s1064_s12  }
   0x6   : > { %s830_s18 = sadd.s32 1, %s777_s15   ;;  %s26_s19 = sadd.s32 1, %s773_s14 }
   0x7   : > { %s23_s20 = ssub.s32 %s777_s15, %s830_s18  ;;  %p33_p0 = scmp.ne.s32.totalorder %s773_s14, %s769_s13 }
   0x8   : > { %p24_p1 = scmp.eq.s32.totalorder %s23_s20, 0  ;;  %p34_p2 = scmp.eq.s32.totalorder %s777_s15, 0 }
   0x9   : > { %p39_p3 = scmp.ne.s32.totalorder %s769_s13, %s765_s12  ;;  %p40_p4 = scmp.eq.s32.totalorder %s826_s16, 0 }
   0xa   : > { %s842_s21 = scalar_select %p24_p1, %s773_s14, %s26_s19  }
   0xb   : > { %p35_p5 = por %p34_p2, %p33_p0  ;;  %p844_p6 = por %p40_p4, %p39_p3 }
   0xc   : > { %p105_p7 = scmp.eq.s32.totalorder %s826_s16, 7  ;;  %p111_p8 = scmp.eq.s32.totalorder %s539_s17, 7 }
   0xd   : > { %p541_p11 = scmp.ge.s32.totalorder %s777_s15, 8 }
   0xe   : > { %p849_p9 = por %p105_p7, %p33_p0  ;;  %p853_p10 = por %p111_p8, %p39_p3 }
   0xf   : > { %133 = sbr.rel (%p541_p11) target bundleno = 52 (0x34), region = 24 }
  0x10   : > { %s1062_s24 = scalar_select %p853_p10, 1, 0 }
  0x14   : > { %136 = sbr.rel (!%p35_p5) target bundleno = 52 (0x34), region = 28  ;;  %s137_s25 = sand.u32 (%p35_p5), 1, %s773_s14  }
  0x15   : > { %s543_s26 = sshll.u32 (%p35_p5), %s777_s15, 4  ;;  %s542_s27 = sshll.u32 (%p35_p5), %s137_s25, 7 }
  0x16   : > { %s143_s28 = ssub.s32 (%p35_p5), 125, %s543_s26  ;;  %s863_s4 = scalar_lea.sflag (%p35_p5), [#allocation3], %s137_s25 }
  0x17   : > { %p144_p12 = scmp.lt.s32.totalorder (%p35_p5), %s143_s28, 16  ;;  %s141_s5 = scalar_lea.vmem (%p35_p5), [#allocation2], %s542_s27 }
  0x19   : > { %s1069_s28 = smov (!%p144_p12, %s143_s28), 16 }
  0x1a   : > { %s860_s29 = sshll.u32 %s1069_s28, 7 }
  0x1b   : > { %s148_s30 = ssub.s32 2048, %s860_s29 }
  0x1c   : > { %149 = vsyncadd %s863_s4, %s148_s30  ;;  %p545_p13 = scmp.ne.s32.totalorder %s860_s29, 0  ;;  %s570_s6 = sshll.u32 %s777_s15, 11 }
  0x1d   : > { %s871_s9 = scalar_lea.hbm %s1056_s0, %s570_s6  ;;  %s154_s10 = sshll.u32 %s141_s5, 4  ;;  %s873_s10 = int_to_ptr.vmem [resolvable:$true] %s154_s10 }
  0x1e   : > { %s687_s11 = scalar_lea.hbm %s871_s9, %s860_s29  ;;  %s691_s20 = scalar_lea.hbm %s1056_s0, 16000 }
  0x1f   : > { %p688_p0 = scmp.ne.s32.totalorder %s871_s9, %s687_s11  ;;  %p692_p3 = scmp.lt.s32.totalorder %s871_s9, %s1056_s0 }
  0x20   : > { %p693_p4 = scmp.lt.s32.totalorder %s691_s20, %s687_s11 }
  0x21   : > { %p689_p1 = pnand %p688_p0, %p545_p13 }
  0x22   : > { %p694_p5 = por %p693_p4, %p692_p3 }
  0x23   : > { %p690_p2 = pneg %p689_p1 }
  0x25   : > { %p695_p7 = pnand %p694_p5, %p690_p2 }
  0x27   : > { %698 = shalt.err (!%p695_p7)
}
  0x28   : > { %s699_s27 = scalar_lea.vmem %s873_s10, %s860_s29  ;;  %s779_s28 = smov [#allocation2]  }
  0x29   : > { %p700_p8 = scmp.ne.s32.totalorder %s873_s10, %s699_s27  ;;  %s703_s30 = sshll.u32 %s779_s28, 4  ;;  %s704_s30 = int_to_ptr.vmem [resolvable:$false] %s703_s30 }
  0x2a   : > { %s705_s5 = scalar_lea.vmem %s704_s30, 4096  ;;  %p706_p0 = scmp.lt.s32.totalorder %s873_s10, %s704_s30 }
  0x2b   : > { %p701_p11 = pnand %p700_p8, %p545_p13  ;;  %p707_p1 = scmp.lt.s32.totalorder %s705_s5, %s699_s27 }
  0x2d   : > { %p702_p12 = pneg %p701_p11  ;;  %p708_p10 = por %p707_p1, %p706_p0 }
  0x2f   : > { %p709_p3 = pnand %p708_p10, %p702_p12 }
  0x31   : > { %712 = shalt.err (!%p709_p3)
}
  0x32   : > { %s780_s6 = smov 128   ;;  %s781_s7 = smov 8  }
  0x33   : > { %160 = dma.hbm_to_vmem [thread:$0]  (%p545_p13), %s871_s9, %s860_s29, %s873_s10, %s863_s4, %s780_s6, %s780_s6, %s781_s7  }
  0x34 PF: > { %p549_p2 = scmp.ge.s32.totalorder %s777_s15, 1  ;;  %p162_p4 = scmp.lt.s32.totalorder %s777_s15, 9 }
  0x36   : > { %p163_p5 = pnand %p549_p2, %p162_p4 }
  0x37   : > { %s902_s8 = sand.u32 (!%p163_p5), 1, %s769_s13  }
  0x38   : > { %166 = sbr.rel (%p163_p5) target bundleno = 336 (0x150), region = 32  ;;  %s550_s11 = sshll.u32 (!%p163_p5), %s902_s8, 7 }
  0x39   : > { %s169_s17 = scalar_lea.sflag (!%p163_p5), [#allocation3], %s902_s8  ;;  %s908_s19 = scalar_lea.vmem (!%p163_p5), [#allocation2], %s550_s11 }
  0x3d   : > { %756 = dma.done.wait (%p844_p6), %s169_s17, 2048  }
  0x3e   : > { %758 = vsyncadd (%p844_p6), %s169_s17, 4294965248  ;;  %v679_v0 = vld [vmem:[%s1057_s1 + $0x38] sm:$0xff]   ;;  %v680_v1 = vld [vmem:[%s1057_s1 + $0x30] sm:$0xff]   ;;  %s562_s10 = sshll.u32 (%p849_p9), %s826_s16, 4 }
  0x3f   : > { %588 = vmatprep.subr.bf16.mxu0 %v679_v0  ;;  %620 = vmatprep.subr.bf16.mxu1 %v679_v0  ;;  %v681_v2 = vld [vmem:[%s1057_s1 + $0x28] sm:$0xff]   ;;  %v682_v3 = vld [vmem:[%s1057_s1 + $0x20] sm:$0xff]   ;;  %v683_v10 = vld [vmem:[%s1057_s1 + $0x18] sm:$0xff]   ;;  %s455_s22 = ssub.s32 (%p849_p9), 125, %s562_s10 }
  0x40   : > { %589 = vmatpush3.bf16.msra.mxu0 %v679_v0  ;;  %628 = vmatpush3.bf16.msra.mxu1 %v679_v0  ;;  %v206_v4 = vld [vmem:[%s908_s19] sm:$0xff]  ;;  %v207_v5 = vld [vmem:[%s908_s19 + $0x8] sm:$0xff]  ;;  %v684_v11 = vld [vmem:[%s1057_s1 + $0x10] sm:$0xff]   ;;  %p456_p6 = scmp.lt.s32.totalorder (%p849_p9), %s455_s22, 16 }
  0x41   : > { %590 = vmatprep.subr.bf16.mxu0 %v680_v1  ;;  %621 = vmatprep.subr.bf16.mxu1 %v680_v1  ;;  %v214_v6 = vld [vmem:[%s908_s19 + $0x40] sm:$0xff]  ;;  %v222_v7 = vpack.c.bf16 %v207_v5, %v206_v4  ;;  %v215_v8 = vld [vmem:[%s908_s19 + $0x48] sm:$0xff]  ;;  %v208_v14 = vld [vmem:[%s908_s19 + $0x10] sm:$0xff] }
  0x42   : > { %v226_v9 = vpack.c.bf16 %v215_v8, %v214_v6  ;;  %v685_v12 = vld [vmem:[%s1057_s1 + $0x8] sm:$0xff]   ;;  %v686_v13 = vld [vmem:[%s1057_s1] sm:$0xff]   ;;  %v209_v15 = vld [vmem:[%s908_s19 + $0x18] sm:$0xff] }
  0x43   : > { %604 = vmatprep.mubr.bf16.mxu0 %v222_v7  ;;  %v216_v16 = vld [vmem:[%s908_s19 + $0x50] sm:$0xff]  ;;  %v217_v17 = vld [vmem:[%s908_s19 + $0x58] sm:$0xff]  ;;  %v210_v18 = vld [vmem:[%s908_s19 + $0x20] sm:$0xff]  ;;  %v223_v22 = vpack.c.bf16 %v209_v15, %v208_v14 }
  0x44   : > { %591 = vmatpush3.bf16.msra.mxu0 %v680_v1  ;;  %629 = vmatpush3.bf16.msra.mxu1 %v680_v1  ;;  %v211_v19 = vld [vmem:[%s908_s19 + $0x28] sm:$0xff]  ;;  %v218_v20 = vld [vmem:[%s908_s19 + $0x60] sm:$0xff]  ;;  %v227_v23 = vpack.c.bf16 %v217_v17, %v216_v16  ;;  %v212_v26 = vld [vmem:[%s908_s19 + $0x30] sm:$0xff] }
  0x45   : > { %592 = vmatprep.subr.bf16.mxu0 %v681_v2  ;;  %622 = vmatprep.subr.bf16.mxu1 %v681_v2  ;;  %v219_v21 = vld [vmem:[%s908_s19 + $0x68] sm:$0xff]  ;;  %v224_v24 = vpack.c.bf16 %v211_v19, %v210_v18  ;;  %v213_v27 = vld [vmem:[%s908_s19 + $0x38] sm:$0xff]  ;;  %v220_v28 = vld [vmem:[%s908_s19 + $0x70] sm:$0xff] }
  0x46   : > { %612 = vmatprep.mubr.bf16.mxu1 %v226_v9  ;;  %v228_v25 = vpack.c.bf16 %v219_v21, %v218_v20  ;;  %v221_v29 = vld [vmem:[%s908_s19 + $0x78] sm:$0xff]  ;;  %v225_v30 = vpack.c.bf16 %v213_v27, %v212_v26  ;;  %v957_v32 = vld [vmem:[%s1058_s2] ss:$0 sm:$0xff]  ;;  %s967_s19 = scalar_lea.vmem [#allocation5], %s550_s11  ;;  %s447_s11 = scalar_lea.sflag [#allocation4], %s902_s8 }
  0x47   : > { %v229_v31 = vpack.c.bf16 %v221_v29, %v220_v28 }
  0x48   : > { %593 = vmatpush3.bf16.msra.mxu0 %v681_v2  ;;  %630 = vmatpush3.bf16.msra.mxu1 %v681_v2 }
  0x49   : > { %594 = vmatprep.subr.bf16.mxu0 %v682_v3  ;;  %623 = vmatprep.subr.bf16.mxu1 %v682_v3 }
  0x4c   : > { %595 = vmatpush3.bf16.msra.mxu0 %v682_v3  ;;  %631 = vmatpush3.bf16.msra.mxu1 %v682_v3 }
  0x4d   : > { %596 = vmatprep.subr.bf16.mxu0 %v683_v10  ;;  %624 = vmatprep.subr.bf16.mxu1 %v683_v10 }
  0x50   : > { %597 = vmatpush3.bf16.msra.mxu0 %v683_v10  ;;  %632 = vmatpush3.bf16.msra.mxu1 %v683_v10 }
  0x51   : > { %598 = vmatprep.subr.bf16.mxu0 %v684_v11  ;;  %625 = vmatprep.subr.bf16.mxu1 %v684_v11 }
  0x54   : > { %599 = vmatpush3.bf16.msra.mxu0 %v684_v11  ;;  %633 = vmatpush3.bf16.msra.mxu1 %v684_v11 }
  0x55   : > { %600 = vmatprep.subr.bf16.mxu0 %v685_v12  ;;  %626 = vmatprep.subr.bf16.mxu1 %v685_v12 }
  0x58   : > { %601 = vmatpush3.bf16.msra.mxu0 %v685_v12  ;;  %634 = vmatpush3.bf16.msra.mxu1 %v685_v12 }
  0x59   : > { %602 = vmatprep.subr.bf16.mxu0 %v686_v13  ;;  %627 = vmatprep.subr.bf16.mxu1 %v686_v13 }
  0x5c   : > { %603 = vmatpush3.bf16.msra.mxu0 %v686_v13  ;;  %635 = vmatpush3.bf16.msra.mxu1 %v686_v13 }
  0x5f   : > { %605 = vmatmul.mubr.bf16.vlgmr.msra.gmra.mxu0 %v223_v22  ;;  %613 = vmatmul.mubr.bf16.vlgmr.msra.gmra.mxu1 %v227_v23 }
  0x60   : > { %608 = vmatprep.mubr.bf16.mxu0 %v224_v24  ;;  %616 = vmatprep.mubr.bf16.mxu1 %v228_v25 }
  0x67   : > { %609 = vmatmul.mubr.bf16.gmra.mxu0 %v225_v30  ;;  %617 = vmatmul.mubr.bf16.gmra.mxu1 %v229_v31 }
 0x11f   : > { %v606_v33 = vpop.f32.mrf.mxu0  ;;  %v614_v34 = vpop.f32.mrf.mxu1 }
 0x120   : > { %v344_v35 = vadd.f32 %v606_v33, %v957_v32  ;;  %v376_v36 = vadd.f32 %v614_v34, %v957_v32 }
 0x121   : > { %v335_v37 = vpop.f32.mrf.mxu0  ;;  %v367_v38 = vpop.f32.mrf.mxu1 }
 0x122   : > { %v400_v39 = vmul.f32 0.01, %v344_v35  ;;  %v408_v40 = vmul.f32 0.01, %v376_v36  ;;  %v336_v41 = vadd.f32 %v957_v32, %v335_v37  ;;  %v368_v42 = vadd.f32 %v957_v32, %v367_v38 }
 0x123   : > { %v607_v43 = vpop.f32.mrf.mxu0  ;;  %v615_v44 = vpop.f32.mrf.mxu1 }
 0x124   : > { %v416_v45 = vmax.f32 %v344_v35, %v400_v39  ;;  %v424_v46 = vmax.f32 %v376_v36, %v408_v40  ;;  %v398_v47 = vmul.f32 0.01, %v336_v41  ;;  %v406_v48 = vmul.f32 0.01, %v368_v42 }
 0x125   : > { %v347_v49 = vadd.f32 %v607_v43, %v957_v32  ;;  %v379_v50 = vadd.f32 %v615_v44, %v957_v32  ;;  %v338_v51 = vpop.f32.mrf.mxu0  ;;  %v370_v52 = vpop.f32.mrf.mxu1 }
 0x126   : > { %432 = vst [vmem:[%s967_s19 + $0x10] sm:$0xff] %v416_v45  ;;  %440 = vst [vmem:[%s967_s19 + $0x50] sm:$0xff] %v424_v46  ;;  %v414_v53 = vmax.f32 %v336_v41, %v398_v47  ;;  %v422_v54 = vmax.f32 %v368_v42, %v406_v48  ;;  %v339_v55 = vadd.f32 %v957_v32, %v338_v51 }
 0x127   : > { %v371_v56 = vadd.f32 %v957_v32, %v370_v52  ;;  %v401_v57 = vmul.f32 0.01, %v347_v49  ;;  %v409_v58 = vmul.f32 0.01, %v379_v50  ;;  %v610_v59 = vpop.f32.mrf.mxu0  ;;  %v618_v60 = vpop.f32.mrf.mxu1 }
 0x128   : > { %430 = vst [vmem:[%s967_s19] sm:$0xff] %v414_v53  ;;  %438 = vst [vmem:[%s967_s19 + $0x40] sm:$0xff] %v422_v54  ;;  %v399_v61 = vmul.f32 0.01, %v339_v55  ;;  %v360_v63 = vadd.f32 %v610_v59, %v957_v32  ;;  %v392_v0 = vadd.f32 %v618_v60, %v957_v32 }
 0x129   : > { %v407_v62 = vmul.f32 0.01, %v371_v56  ;;  %v417_v1 = vmax.f32 %v347_v49, %v401_v57  ;;  %v425_v2 = vmax.f32 %v379_v50, %v409_v58  ;;  %v351_v3 = vpop.f32.mrf.mxu0  ;;  %v383_v4 = vpop.f32.mrf.mxu1 }
 0x12a   : > { %v415_v5 = vmax.f32 %v339_v55, %v399_v61  ;;  %v404_v7 = vmul.f32 0.01, %v360_v63  ;;  %v412_v8 = vmul.f32 0.01, %v392_v0  ;;  %v352_v9 = vadd.f32 %v957_v32, %v351_v3 }
 0x12b   : > { %v423_v6 = vmax.f32 %v371_v56, %v407_v62  ;;  %433 = vst [vmem:[%s967_s19 + $0x18] sm:$0xff] %v417_v1  ;;  %441 = vst [vmem:[%s967_s19 + $0x58] sm:$0xff] %v425_v2  ;;  %v384_v10 = vadd.f32 %v957_v32, %v383_v4  ;;  %v611_v11 = vpop.f32.mrf.mxu0  ;;  %v619_v12 = vpop.f32.mrf.mxu1 }
 0x12c   : > { %431 = vst [vmem:[%s967_s19 + $0x8] sm:$0xff] %v415_v5  ;;  %v420_v13 = vmax.f32 %v360_v63, %v404_v7  ;;  %v428_v14 = vmax.f32 %v392_v0, %v412_v8  ;;  %v363_v15 = vadd.f32 %v611_v11, %v957_v32  ;;  %v395_v16 = vadd.f32 %v619_v12, %v957_v32 }
 0x12d   : > { %439 = vst [vmem:[%s967_s19 + $0x48] sm:$0xff] %v423_v6  ;;  %v402_v17 = vmul.f32 0.01, %v352_v9  ;;  %v410_v18 = vmul.f32 0.01, %v384_v10  ;;  %v354_v19 = vpop.f32.mrf.mxu0  ;;  %v386_v20 = vpop.f32.mrf.mxu1 }
 0x12e   : > { %436 = vst [vmem:[%s967_s19 + $0x30] sm:$0xff] %v420_v13  ;;  %444 = vst [vmem:[%s967_s19 + $0x70] sm:$0xff] %v428_v14  ;;  %v405_v21 = vmul.f32 0.01, %v363_v15  ;;  %v413_v22 = vmul.f32 0.01, %v395_v16  ;;  %v355_v23 = vadd.f32 %v957_v32, %v354_v19  ;;  %v387_v24 = vadd.f32 %v957_v32, %v386_v20 }
 0x12f   : > { %v418_v25 = vmax.f32 %v352_v9, %v402_v17  ;;  %v426_v26 = vmax.f32 %v384_v10, %v410_v18 }
 0x130   : > { %v421_v27 = vmax.f32 %v363_v15, %v405_v21  ;;  %v429_v28 = vmax.f32 %v395_v16, %v413_v22  ;;  %v403_v29 = vmul.f32 0.01, %v355_v23  ;;  %v411_v30 = vmul.f32 0.01, %v387_v24  ;;  %453 = sbr.rel (!%p849_p9) target bundleno = 336 (0x150), region = 40 }
 0x131   : > { %434 = vst [vmem:[%s967_s19 + $0x20] sm:$0xff] %v418_v25  ;;  %442 = vst [vmem:[%s967_s19 + $0x60] sm:$0xff] %v426_v26 }
 0x132   : > { %437 = vst [vmem:[%s967_s19 + $0x38] sm:$0xff] %v421_v27  ;;  %445 = vst [vmem:[%s967_s19 + $0x78] sm:$0xff] %v429_v28  ;;  %v419_v31 = vmax.f32 %v355_v23, %v403_v29  ;;  %v427_v33 = vmax.f32 %v387_v24, %v411_v30 }
 0x134   : > { %435 = vst [vmem:[%s967_s19 + $0x28] sm:$0xff] %v419_v31  ;;  %443 = vst [vmem:[%s967_s19 + $0x68] sm:$0xff] %v427_v33 }
 0x135   : > { %s1071_s22 = smov (!%p456_p6, %s455_s22), 16 }
 0x136   : > { %s999_s20 = sshll.u32 %s1071_s22, 7 }
 0x137   : > { %s460_s25 = ssub.s32 2048, %s999_s20 }
 0x138   : > { %461 = vsyncadd %s447_s11, %s460_s25  ;;  %p564_p10 = scmp.ne.s32.totalorder %s999_s20, 0  ;;  %s571_s23 = sshll.u32 %s826_s16, 11 }
 0x139   : > { %s1009_s28 = scalar_lea.hbm %s1059_s3, %s571_s23  ;;  %s466_s30 = sshll.u32 %s967_s19, 4  ;;  %s1012_s30 = int_to_ptr.vmem [resolvable:$true] %s466_s30 }
 0x13a   : > { %s713_s5 = scalar_lea.vmem %s1012_s30, %s999_s20  ;;  %s782_s6 = smov [#allocation5]  }
 0x13b   : > { %p714_p9 = scmp.ne.s32.totalorder %s1012_s30, %s713_s5  ;;  %s717_s7 = sshll.u32 %s782_s6, 4  ;;  %s718_s7 = int_to_ptr.vmem [resolvable:$false] %s717_s7 }
 0x13c   : > { %s719_s16 = scalar_lea.vmem %s718_s7, 4096  ;;  %p720_p8 = scmp.lt.s32.totalorder %s1012_s30, %s718_s7 }
 0x13d   : > { %p715_p13 = pnand %p714_p9, %p564_p10  ;;  %p721_p11 = scmp.lt.s32.totalorder %s719_s16, %s713_s5 }
 0x13f   : > { %p716_p7 = pneg %p715_p13  ;;  %p722_p12 = por %p721_p11, %p720_p8 }
 0x141   : > { %p723_p0 = pnand %p722_p12, %p716_p7 }
 0x143   : > { %726 = shalt.err (!%p723_p0)
}
 0x144   : > { %s727_s17 = scalar_lea.hbm %s1009_s28, %s999_s20  ;;  %s731_s9 = scalar_lea.hbm %s1059_s3, 16000 }
 0x145   : > { %p728_p1 = scmp.ne.s32.totalorder %s1009_s28, %s727_s17  ;;  %p732_p4 = scmp.lt.s32.totalorder %s1009_s28, %s1059_s3 }
 0x146   : > { %p733_p5 = scmp.lt.s32.totalorder %s731_s9, %s727_s17 }
 0x147   : > { %p729_p3 = pnand %p728_p1, %p564_p10 }
 0x148   : > { %p734_p6 = por %p733_p5, %p732_p4 }
 0x149   : > { %p730_p2 = pneg %p729_p3 }
 0x14b   : > { %p735_p9 = pnand %p734_p6, %p730_p2 }
 0x14d   : > { %738 = shalt.err (!%p735_p9)
}
 0x14e   : > { %s783_s22 = smov 128   ;;  %s784_s25 = smov 8  }
 0x14f   : > { %472 = dma.vmem_to_hbm [thread:$0]  (%p564_p10), %s1012_s30, %s999_s20, %s1009_s28, %s447_s11, %s783_s22, %s783_s22, %s784_s25  }
 0x150 PF: > { %p642_p13 = scmp.ge.s32.totalorder %s777_s15, 2  ;;  %s481_s23 = sand.u32 1, %s765_s12  }
 0x151   : > { %p1063_p7 = scmp.ne.s32.totalorder %s1062_s24, 0  ;;  %s482_s26 = scalar_lea.sflag [#allocation4], %s481_s23 }
 0x153   : > { %p639_p8 = pnand %p642_p13, %p1063_p7 }
 0x155   : > { %p640_p11 = pneg %p639_p8 }
 0x157   : > { %760 = dma.done.wait (%p640_p11), %s482_s26, 2048  }
 0x158   : > { %762 = vsyncadd (%p640_p11), %s482_s26, 4294965248  ;;  %p16_p12 = scmp.ge.s32.totalorder %s830_s18, 10   ;;  %s1064_s12 = smov %s769_s13 }
 0x159   : > { %s1065_s13 = smov %s773_s14  ;;  %s1066_s14 = smov %s842_s21 }
 0x15a   : > { %s1067_s15 = smov %s830_s18  ;;  %18 = sbr.rel (!%p16_p12) target bundleno = 5 (0x5), region = 77 }
 0x15f   :  { %487 = vsyncpa [#allocation3], 1 }
 0x160   :  { %489 = vsyncpa [#allocation3 + $0x1], 1 }
 0x161   :  { %490 = vsyncpa [#allocation4], 1 }
 0x162   :  { %492 = vsyncpa [#allocation4 + $0x1], 1 }

</bundles_post_ra>
